<compile_context>
chip_gen: v5e
topology: v5e:2x2
jax: 0.10.0
libtpu: 0.0.40
codegen_flags: <defaults>
</compile_context>

<pallas_src>
import functools

import jax
import jax.numpy as jnp
from jax import lax
from jax.experimental import pallas as pl
from jax.experimental.pallas import tpu as pltpu


def _round_up(x, m):
    return ((x + m - 1) // m) * m


def _dense_dirichlet_kernel(x_ref, w_ref, b_ref,
                            alpha_ref, prob_ref, epi_ref, alea_ref,
                            *, total_rows, tile_rows, ragged):
    # x_ref: [TB, in_dim]   batch tile (pipelined)
    # w_ref: [in_dim, K]    resident
    # b_ref: [1, K]         resident
    out = jnp.dot(x_ref[...], w_ref[...],
                  preferred_element_type=jnp.float32) + b_ref[...]   # [TB, K] f32

    if ragged:
        # Zero the pre-activation of padded tail rows so exp/log never see
        # garbage (rows are independent; padded outputs are dropped on writeback).
        row = (pl.program_id(0) * tile_rows
               + lax.broadcasted_iota(jnp.int32, out.shape, 0))
        out = jnp.where(row < total_rows, out, 0.0)

    evidence = jnp.exp(out)                              # EUP
    alpha = evidence + 1.0                               # [TB, K]

    S = jnp.sum(alpha, axis=1, keepdims=True)            # [TB, 1]
    inv_S = pl.reciprocal(S, approx=True)                # EUP approx
    inv_S = inv_S * (2.0 - S * inv_S)                    # one Newton step -> f32 acc.

    prob = alpha * inv_S                                 # [TB, K]
    K = alpha.shape[1]

    alpha_ref[...] = alpha
    prob_ref[...] = prob
    epi_ref[...] = jnp.float32(K) * inv_S                                  # [TB, 1]
    alea_ref[...] = -jnp.sum(prob * jnp.log(prob), axis=1, keepdims=True)  # [TB, 1]


def _choose_batch_tile(B, in_dim, K, x_itemsize, vmem_tile_budget):
    """Pick the batch tile TB from a VMEM budget (double-buffered, lane-padded)."""
    lane = 128
    per_row = 2 * _round_up(in_dim, lane) * x_itemsize      # x tile, 2 buffers
    per_row += 2 * 2 * _round_up(K, lane) * 4               # alpha + prob (f32)
    per_row += 2 * 2 * _round_up(1, lane) * 4               # epi + alea   (f32)
    cap = max(128, ((vmem_tile_budget // per_row) // 128) * 128)
    if B <= 256:
        return B, per_row                                   # single step is fine
    # >= 2 grid steps so v7x's two TensorCores both get work; VMEM-capped.
    tb = min(cap, _round_up((B + 1) // 2, 128))
    return tb, per_row


def dense_dirichlet(x, w, b, *, vmem_tile_budget=14 << 20):
    """x: [B, in_dim]; w: [in_dim, K] (= W^T of nn.Linear); b: [K]."""
    B, in_dim = x.shape
    K = w.shape[1]

    w = jnp.asarray(w, x.dtype)                       # consumed as [in_dim, K]
    b_row = jnp.asarray(b, jnp.float32).reshape(1, K)

    TB, per_row = _choose_batch_tile(B, in_dim, K, x.dtype.itemsize, vmem_tile_budget)
    grid = (pl.cdiv(B, TB),)
    ragged = (B % TB) != 0

    # Explicit scoped-VMEM limit sized to the double-buffered footprint
    # (raises v5e's 16 MiB default; stays within v7x's 64 MiB physical VMEM).
    w_vmem = 2 * _round_up(in_dim, 8) * _round_up(K, 128) * w.dtype.itemsize
    b_vmem = 2 * 8 * 128 * 4
    est_vmem = TB * per_row + w_vmem + b_vmem
    vmem_limit = int(max(32 << 20, est_vmem + (4 << 20)))
    # TODO(synk): for very large in_dim (>~4K), add an "arbitrary" contraction grid
    # axis with a VMEM f32 accumulator instead of one full-in_dim x tile per step.

    kernel = functools.partial(_dense_dirichlet_kernel,
                               total_rows=B, tile_rows=TB, ragged=ragged)

    out_shape = (
        jax.ShapeDtypeStruct((B, K), jnp.float32),    # alpha
        jax.ShapeDtypeStruct((B, K), jnp.float32),    # prob
        jax.ShapeDtypeStruct((B, 1), jnp.float32),    # epistemic
        jax.ShapeDtypeStruct((B, 1), jnp.float32),    # aleatoric
    )

    cost = pl.CostEstimate(
        flops=2 * B * in_dim * K,
        transcendentals=B * (2 * K + 1),              # exp + log per class, 1/S per row
        bytes_accessed=(x.size * x.dtype.itemsize
                        + w.size * w.dtype.itemsize + K * 4
                        + (2 * B * K + 2 * B) * 4),
    )

    return pl.pallas_call(
        kernel,
        out_shape=out_shape,
        grid=grid,
        in_specs=[
            pl.BlockSpec((TB, in_dim), lambda i: (i, 0)),   # x batch tile (pipelined)
            pl.BlockSpec((in_dim, K), lambda i: (0, 0)),    # weight (resident)
            pl.BlockSpec((1, K), lambda i: (0, 0)),         # bias   (resident)
        ],
        out_specs=[
            pl.BlockSpec((TB, K), lambda i: (i, 0)),        # alpha  [B, K]
            pl.BlockSpec((TB, K), lambda i: (i, 0)),        # prob   [B, K]
            pl.BlockSpec((TB, 1), lambda i: (i, 0)),        # epi    [B, 1]
            pl.BlockSpec((TB, 1), lambda i: (i, 0)),        # alea   [B, 1]
        ],
        compiler_params=pltpu.CompilerParams(
            dimension_semantics=("parallel",),
            vmem_limit_bytes=vmem_limit),
        cost_estimate=cost,
    )(x, w, b_row)


def _reference(x, w, b):
    out = x @ w + b[None, :]
    alpha = jnp.exp(out) + 1.0
    S = jnp.sum(alpha, axis=1, keepdims=True)
    prob = alpha / S
    epi = alpha.shape[-1] / S
    alea = -jnp.sum(prob * jnp.log(prob), axis=-1, keepdims=True)
    return alpha, prob, epi, alea


def _check(B, in_dim, out_dim, key):
    kx, kw, kb = jax.random.split(key, 3)
    # Deterministic init mimicking nn.Linear's uniform(-1/sqrt(in), 1/sqrt(in)).
    bound = 1.0 / jnp.sqrt(jnp.float32(in_dim))
    w = jax.random.uniform(kw, (in_dim, out_dim), jnp.float32, -bound, bound)
    b = jax.random.uniform(kb, (out_dim,), jnp.float32, -bound, bound)
    x = jax.random.normal(kx, (B, in_dim), jnp.float32)

    outs = dense_dirichlet(x, w, b)
    jax.block_until_ready(outs)

    refs = _reference(x, w, b)
    for got, want in zip(outs, refs):
        assert got.shape == want.shape, (got.shape, want.shape)
        assert jnp.allclose(got, want, rtol=1e-5, atol=1e-5)


if __name__ == "__main__":
    key = jax.random.PRNGKey(0)
    k1, k2 = jax.random.split(key)
    # Small primary check (typical evidential head size).
    _check(B=8, in_dim=32, out_dim=8, key=k1)
    # Multi-step "parallel" grid with a ragged tail (exercises masking + pipelining).
    _check(B=300, in_dim=32, out_dim=8, key=k2)
    print("KERNEL_OK")
</pallas_src>

<mosaic_0001>
module attributes {stable_mosaic.version = 11 : i64} {
  func.func @_dense_dirichlet_kernel(%arg0: i32, %arg1: memref<8x32xf32, #tpu.memory_space<vmem>>, %arg2: memref<32x8xf32, #tpu.memory_space<vmem>>, %arg3: memref<1x8xf32, #tpu.memory_space<vmem>>, %arg4: memref<8x8xf32, #tpu.memory_space<vmem>>, %arg5: memref<8x8xf32, #tpu.memory_space<vmem>>, %arg6: memref<8x1xf32, #tpu.memory_space<vmem>>, %arg7: memref<8x1xf32, #tpu.memory_space<vmem>>) attributes {dimension_semantics = [#tpu.dimension_semantics<parallel>], iteration_bounds = array<i64: 1>, scalar_prefetch = 0 : i64, scratch_operands = 0 : i64, tpu.core_type = #tpu.core_type<tc>, window_params = [{transform_indices = @transform_0, window_bounds = array<i64: 8, 32>}, {pipeline_mode = #tpu.pipeline_mode<synchronous>, transform_indices = @transform_1, window_bounds = array<i64: 32, 8>}, {pipeline_mode = #tpu.pipeline_mode<synchronous>, transform_indices = @transform_2, window_bounds = array<i64: 1, 8>}, {transform_indices = @transform_3, window_bounds = array<i64: 8, 8>}, {transform_indices = @transform_4, window_bounds = array<i64: 8, 8>}, {transform_indices = @transform_5, window_bounds = array<i64: 8, 1>}, {transform_indices = @transform_6, window_bounds = array<i64: 8, 1>}]} {
    %c0 = arith.constant 0 : index
    %c0_0 = arith.constant 0 : index
    %0 = vector.load %arg1[%c0, %c0_0] : memref<8x32xf32, #tpu.memory_space<vmem>>, vector<8x32xf32>
    %c0_1 = arith.constant 0 : index
    %c0_2 = arith.constant 0 : index
    %1 = vector.load %arg2[%c0_1, %c0_2] : memref<32x8xf32, #tpu.memory_space<vmem>>, vector<32x8xf32>
    %cst = arith.constant dense<0.000000e+00> : vector<8x8xf32>
    %2 = tpu.matmul %0, %1, %cst {dimension_numbers = #tpu.dot_dimension_numbers<[1], [0], [0], [1], [0, 0, 1, 1], [], []>} : vector<8x32xf32>, vector<32x8xf32>, vector<8x8xf32> -> vector<8x8xf32>
    %c0_3 = arith.constant 0 : index
    %c0_4 = arith.constant 0 : index
    %3 = vector.load %arg3[%c0_3, %c0_4] : memref<1x8xf32, #tpu.memory_space<vmem>>, vector<1x8xf32>
    %4 = vector.broadcast %3 : vector<1x8xf32> to vector<8x8xf32>
    %5 = arith.addf %2, %4 : vector<8x8xf32>
    %6 = math.exp %5 : vector<8x8xf32>
    %cst_5 = arith.constant 1.000000e+00 : f32
    %7 = vector.broadcast %cst_5 : f32 to vector<8x8xf32>
    %8 = arith.addf %6, %7 : vector<8x8xf32>
    %cst_6 = arith.constant dense<0.000000e+00> : vector<8xf32>
    %9 = vector.multi_reduction <add>, %8, %cst_6 [1] : vector<8x8xf32> to vector<8xf32>
    %10 = vector.shape_cast %9 : vector<8xf32> to vector<8x1xf32>
    %11 = tpu.reciprocal %10 {approx = true} : vector<8x1xf32> -> vector<8x1xf32>
    %12 = arith.mulf %10, %11 : vector<8x1xf32>
    %cst_7 = arith.constant 2.000000e+00 : f32
    %13 = vector.broadcast %cst_7 : f32 to vector<8x1xf32>
    %14 = arith.subf %13, %12 : vector<8x1xf32>
    %15 = arith.mulf %11, %14 : vector<8x1xf32>
    %16 = vector.broadcast %15 : vector<8x1xf32> to vector<8x8xf32>
    %17 = arith.mulf %8, %16 : vector<8x8xf32>
    %c0_8 = arith.constant 0 : index
    %c0_9 = arith.constant 0 : index
    %18 = vector.load %arg4[%c0_8, %c0_9] : memref<8x8xf32, #tpu.memory_space<vmem>>, vector<8x8xf32>
    tpu.vector_store %arg4[%c0_8, %c0_9], %8 {strides = array<i32>} : memref<8x8xf32, #tpu.memory_space<vmem>>, vector<8x8xf32>,
    %c0_10 = arith.constant 0 : index
    %c0_11 = arith.constant 0 : index
    %19 = vector.load %arg5[%c0_10, %c0_11] : memref<8x8xf32, #tpu.memory_space<vmem>>, vector<8x8xf32>
    tpu.vector_store %arg5[%c0_10, %c0_11], %17 {strides = array<i32>} : memref<8x8xf32, #tpu.memory_space<vmem>>, vector<8x8xf32>,
    %cst_12 = arith.constant 8.000000e+00 : f32
    %20 = vector.broadcast %cst_12 : f32 to vector<8x1xf32>
    %21 = arith.mulf %20, %15 : vector<8x1xf32>
    %c0_13 = arith.constant 0 : index
    %c0_14 = arith.constant 0 : index
    %22 = vector.load %arg6[%c0_13, %c0_14] : memref<8x1xf32, #tpu.memory_space<vmem>>, vector<8x1xf32>
    tpu.vector_store %arg6[%c0_13, %c0_14], %21 {strides = array<i32>} : memref<8x1xf32, #tpu.memory_space<vmem>>, vector<8x1xf32>,
    %23 = math.log %17 : vector<8x8xf32>
    %24 = arith.mulf %17, %23 : vector<8x8xf32>
    %cst_15 = arith.constant dense<0.000000e+00> : vector<8xf32>
    %25 = vector.multi_reduction <add>, %24, %cst_15 [1] : vector<8x8xf32> to vector<8xf32>
    %26 = vector.shape_cast %25 : vector<8xf32> to vector<8x1xf32>
    %cst_16 = arith.constant 0.000000e+00 : f32
    %27 = vector.broadcast %cst_16 : f32 to vector<8x1xf32>
    %28 = arith.subf %27, %26 : vector<8x1xf32>
    %c0_17 = arith.constant 0 : index
    %c0_18 = arith.constant 0 : index
    %29 = vector.load %arg7[%c0_17, %c0_18] : memref<8x1xf32, #tpu.memory_space<vmem>>, vector<8x1xf32>
    tpu.vector_store %arg7[%c0_17, %c0_18], %28 {strides = array<i32>} : memref<8x1xf32, #tpu.memory_space<vmem>>, vector<8x1xf32>,
    return
  }
  func.func @transform_0(%arg0: i32) -> (i32, i32) {
    %c0_i32 = arith.constant 0 : i32
    %c0_i32_0 = arith.constant 0 : i32
    return %arg0, %c0_i32 : i32, i32
  }
  func.func @transform_1(%arg0: i32) -> (i32, i32) {
    %c0_i32 = arith.constant 0 : i32
    %c0_i32_0 = arith.constant 0 : i32
    %c0_i32_1 = arith.constant 0 : i32
    return %c0_i32, %c0_i32_0 : i32, i32
  }
  func.func @transform_2(%arg0: i32) -> (i32, i32) {
    %c0_i32 = arith.constant 0 : i32
    %c0_i32_0 = arith.constant 0 : i32
    %c0_i32_1 = arith.constant 0 : i32
    return %c0_i32, %c0_i32_0 : i32, i32
  }
  func.func @transform_3(%arg0: i32) -> (i32, i32) {
    %c0_i32 = arith.constant 0 : i32
    %c0_i32_0 = arith.constant 0 : i32
    return %arg0, %c0_i32 : i32, i32
  }
  func.func @transform_4(%arg0: i32) -> (i32, i32) {
    %c0_i32 = arith.constant 0 : i32
    %c0_i32_0 = arith.constant 0 : i32
    return %arg0, %c0_i32 : i32, i32
  }
  func.func @transform_5(%arg0: i32) -> (i32, i32) {
    %c0_i32 = arith.constant 0 : i32
    %c0_i32_0 = arith.constant 0 : i32
    return %arg0, %c0_i32 : i32, i32
  }
  func.func @transform_6(%arg0: i32) -> (i32, i32) {
    %c0_i32 = arith.constant 0 : i32
    %c0_i32_0 = arith.constant 0 : i32
    return %arg0, %c0_i32 : i32, i32
  }
}

</mosaic_0001>

<bundles_post_ra>
// kernel: tpu_custom_call.1
= control target key start
LH: loop header
LB: loop body
LE: loop exit
PB: predicated region body
PF: predicated region fallthrough
CT: control target
= control target key end

     0   :  { %12 = vsyncpa [#allocation3], 0  ;;  %s253_s0 = inlined_call_operand.vmem [shape: f32[8,32], index: 0, kind: input, shape index: {}]   ;;  %s254_s1 = inlined_call_operand.vmem [shape: f32[32,8], index: 1, kind: input, shape index: {}]   ;;  %s255_s2 = inlined_call_operand.vmem [shape: f32[1,8], index: 2, kind: input, shape index: {}]   ;;  %s256_s3 = inlined_call_operand.hbm [shape: f32[8,8], index: 3, kind: output, shape index: {0}]   ;;  %s257_s4 = inlined_call_operand.hbm [shape: f32[8,8], index: 4, kind: output, shape index: {1}]   ;;  %s258_s5 = inlined_call_operand.vmem [shape: f32[8,1], index: 5, kind: output, shape index: {2}]   ;;  %s259_s6 = inlined_call_operand.vmem [shape: f32[8,1], index: 6, kind: output, shape index: {3}]  }
   0x1   :  { %v24_v0 = vld [vmem:[%s254_s1 + $0x18] sm:$0xff]  ;;  %v23_v1 = vld [vmem:[%s254_s1 + $0x10] sm:$0xff]  ;;  %v22_v2 = vld [vmem:[%s254_s1 + $0x8] sm:$0xff] }
   0x2   :  { %45 = vmatpush.msra.mxu0 %v24_v0 }
   0x3   :  { %13 = vsyncpa [#allocation5], 0  ;;  %v21_v3 = vld [vmem:[%s254_s1] sm:$0xff]  ;;  %vm29_vm0 = vcmask 261120   ;;  %vm56_vm1 = vcmask 64512   ;;  %vm68_vm2 = vcmask 7168  }
   0x4   :  { %46 = vmatpush.msra.mxu0 %v23_v1  ;;  %v20_v4 = vld [vmem:[%s253_s0] sm:$0xff]  ;;  %s85_s12 = sshll.u32 %s256_s3, 4  ;;  %s181_s13 = smov [#allocation4]   ;;  %s86_s12 = int_to_ptr.hbm [resolvable:$true] %s85_s12 }
   0x5   :  { %v121_v5 = vld [vmem:[%s255_s2] ss:$0 sm:$0xff]  ;;  %s180_s2 = smov [#allocation2]   ;;  %s94_s14 = sshll.u32 %s181_s13, 4  ;;  %s95_s14 = int_to_ptr.vmem [resolvable:$true] %s94_s14 }
   0x6   :  { %47 = vmatpush.msra.mxu0 %v22_v2  ;;  %s83_s9 = sshll.u32 %s180_s2, 4  ;;  %s96_s17 = sshll.u32 %s257_s4, 4  ;;  %s84_s9 = int_to_ptr.vmem [resolvable:$true] %s83_s9  ;;  %s97_s17 = int_to_ptr.hbm [resolvable:$true] %s96_s17 }
   0x8   :  { %48 = vmatpush.msra.mxu0 %v21_v3 }
   0x9   :  { %118 = vmatmul.msk.f32.vlgmr.msra.gmra.mxu0 %vm29_vm0, %v20_v4 }
  0x86   :  { %v50_v6 = vpop.f32.mrf.mxu0 }
  0x87   :  { %v51_v7 = vadd.f32 %v121_v5, %v50_v6 }
  0x89   :  { %v53_v8 = vmul.f32 1.442695, %v51_v7 }
  0x8b   :  { %122 = vpow2.f32 %v53_v8 }
  0x91   :  { %v123_v9 = vpop.eup %122 }
  0x92   :  { %v55_v10 = vadd.f32 1.0, %v123_v9 }
  0x94   :  { %v57_v11 = vsel %vm56_vm1, %v55_v10, 0.0  ;;  %65 = vst.msk [vmem:[#allocation2] sm:$0xff] %vm56_vm1, %v55_v10 }
  0x95   :  { %58 = vadd.xlane.f32.xlu0 %v57_v11  ;;  %88 = dma.vmem_to_hbm [thread:$0]  %s84_s9, 128, %s86_s12, [#allocation3]  }
 0x108   :  { %v59_v12 = vpop.xlane.xlu0 %58 }
 0x109   :  { %124 = vrcp.f32 %v59_v12 }
 0x10f   :  { %v125_v13 = vpop.eup %124 }
 0x110   :  { %v61_v14 = vmul.f32 %v125_v13, %v59_v12 }
 0x112   :  { %v62_v15 = vsub.f32 2.0, %v61_v14 }
 0x114   :  { %v63_v16 = vmul.f32 %v125_v13, %v62_v15 }
 0x116   :  { %v64_v17 = vmul.f32 %v63_v16, %v55_v10  ;;  %v67_v18 = vmul.f32 8.0, %v63_v16 }
 0x118   :  { %66 = vst.msk [vmem:[#allocation4] sm:$0xff] %vm56_vm1, %v64_v17  ;;  %126 = vlog2.f32 %v64_v17 }
 0x119   :  { %69 = vst.msk [vmem:[%s258_s5] sm:$0xff] %vm68_vm2, %v67_v18  ;;  %99 = dma.vmem_to_hbm [thread:$0]  %s95_s14, 128, %s97_s17, [#allocation5]  }
 0x11e   :  { %v127_v19 = vpop.eup %126 }
 0x11f   :  { %v71_v20 = vmul.f32 0.6931472, %v127_v19 }
 0x121   :  { %v72_v21 = vmul.f32 %v71_v20, %v64_v17 }
 0x123   :  { %v73_v22 = vsel %vm56_vm1, %v72_v21, 0.0 }
 0x124   :  { %74 = vadd.xlane.f32.xlu0 %v73_v22 }
 0x197   :  { %v75_v23 = vpop.xlane.xlu0 %74 }
 0x198   :  { %v76_v24 = vsub.f32 0.0, %v75_v23 }
 0x19a   :  { %77 = vst.msk [vmem:[%s259_s6] sm:$0xff] %vm68_vm2, %v76_v24 }
 0x19b   :  { %176 = dma.done.wait [#allocation3], 128  }
 0x19c   :  { %177 = vsyncadd [#allocation3], 4294967168 }
 0x19d   :  { %178 = dma.done.wait [#allocation5], 128  }
 0x19e   :  { %179 = vsyncadd [#allocation5], 4294967168 }
 0x19f   :  { %116 = vsyncpa [#allocation3], 1 }
 0x1a0   :  { %117 = vsyncpa [#allocation5], 1 }

</bundles_post_ra>
